<compile_context>
chip_gen: v6e
topology: v6e:2x2x1
jax: 0.10.0
libtpu: 0.0.40
codegen_flags: <defaults>
</compile_context>

<pallas_src>
import math

import jax
import jax.numpy as jnp
from jax.experimental import pallas as pl
from jax.experimental.pallas import tpu as pltpu


_LANE = 128
_SUBLANE = 8
_TARGET_TILE_BYTES = 2 * 1024 * 1024    # ~2 MiB per input/output tile
_VMEM_LIMIT_BYTES = 32 * 1024 * 1024    # explicit scoped-VMEM budget (safe on v5e/v6e/v7x)


# ---------------------------------------------------------------------------
# Kernel (shared): pure VPU elementwise add, bias broadcasts inside the kernel.
# ---------------------------------------------------------------------------
def _add_kernel(x_ref, b_ref, o_ref):
    o_ref[...] = x_ref[...] + b_ref[...]


# ---------------------------------------------------------------------------
# Helpers
# ---------------------------------------------------------------------------
def _tiled_add_2d(x, b_row):
    """x: (R, L), b_row: (1, L). Row-tiled, pipelined elementwise add."""
    R, L = x.shape
    itemsize = jnp.dtype(x.dtype).itemsize
    row_bytes = L * itemsize

    # Rows per tile: multiple of 8 (sublane rule), ~2 MiB per buffer.
    tm = max(_SUBLANE,
             (_TARGET_TILE_BYTES // max(row_bytes, 1)) // _SUBLANE * _SUBLANE)
    if R <= tm:
        tm = R  # block dim == full array dim is always legal

    grid = (pl.cdiv(R, tm),)
    return pl.pallas_call(
        _add_kernel,
        out_shape=jax.ShapeDtypeStruct((R, L), x.dtype),
        grid=grid,
        in_specs=[
            pl.BlockSpec((tm, L), lambda i: (i, 0)),
            pl.BlockSpec((1, L), lambda i: (0, 0)),   # bias: same block every step
        ],
        out_specs=pl.BlockSpec((tm, L), lambda i: (i, 0)),
        compiler_params=pltpu.CompilerParams(
            dimension_semantics=("parallel",),        # v7x: shard rows across 2 TCs
            vmem_limit_bytes=_VMEM_LIMIT_BYTES,
        ),
    )(x, b_row)


# ---------------------------------------------------------------------------
# Public wrappers
# ---------------------------------------------------------------------------
def add_bias_2d(x, bias):
    """x: (N, C), bias: (C,) -> x + bias[None, :]."""
    N, C = x.shape
    assert bias.shape == (C,)

    total = N * C
    lanes = (C * _LANE) // math.gcd(C, _LANE)   # lcm(C, 128)
    if total % lanes == 0:
        # Lane-dense refold: rows of `lanes` elements (multiple of 128 lanes).
        # Each refolded row holds lanes // C whole original rows, so the bias
        # pattern per lane is simply bias tiled lanes // C times.
        rows = total // lanes
        x2 = x.reshape(rows, lanes)
        b2 = jnp.tile(bias, lanes // C).reshape(1, lanes)
        out = _tiled_add_2d(x2, b2)
        return out.reshape(N, C)

    # Fallback: (TM, C) blocks. C == full dim keeps the block legal even when
    # C is not a multiple of 128 (stores may be lane-masked in this path).
    return _tiled_add_2d(x, bias.reshape(1, C))


def add_bias_4d(x, bias):
    """x: (N, C, H, W) NCHW, bias: (C,) -> x + bias[None, :, None, None]."""
    N, C, H, W = x.shape
    assert bias.shape == (C,)
    HW = H * W
    itemsize = jnp.dtype(x.dtype).itemsize

    x3 = x.reshape(N, C, HW)       # glue reshape (no data movement)
    b3 = bias.reshape(1, C, 1)     # matches self._bias = bias.unsqueeze(1)

    # Fold batch into the block so each grid step moves multiple MiB.
    img_bytes = C * HW * itemsize
    tb = max(1, _TARGET_TILE_BYTES // max(img_bytes, 1))
    tb = min(tb, N)
    grid = (pl.cdiv(N, tb),)

    out = pl.pallas_call(
        _add_kernel,
        out_shape=jax.ShapeDtypeStruct((N, C, HW), x.dtype),
        grid=grid,
        in_specs=[
            # NOTE: the block keeps the FULL C and FULL HW dims. C (e.g. 4) is
            # not a multiple of 8, so tiling the channel axis would violate the
            # (8, 128) block rule; the full-dim exception makes this legal.
            pl.BlockSpec((tb, C, HW), lambda i: (i, 0, 0)),
            pl.BlockSpec((1, C, 1), lambda i: (0, 0, 0)),   # bias, resident
        ],
        out_specs=pl.BlockSpec((tb, C, HW), lambda i: (i, 0, 0)),
        compiler_params=pltpu.CompilerParams(
            dimension_semantics=("parallel",),              # v7x megacore split
            vmem_limit_bytes=_VMEM_LIMIT_BYTES,
        ),
    )(x3, b3)
    return out.reshape(N, C, H, W)


# ---------------------------------------------------------------------------
# Main
# ---------------------------------------------------------------------------
if __name__ == "__main__":
    key = jax.random.PRNGKey(0)
    k1, k2, k3, k4, k5 = jax.random.split(key, 5)

    C = 4
    # Module parameter: AddBias is constructed from a (C,) bias tensor.
    bias = jax.random.normal(k1, (C,), dtype=jnp.float32)

    # --- 4D case: NCHW input (batch=2, channels=4, spatial=16x16) ---
    x4 = jax.random.normal(k2, (2, C, 16, 16), dtype=jnp.float32)
    out4 = jax.block_until_ready(add_bias_4d(x4, bias))
    ref4 = x4 + bias.reshape(1, C, 1, 1)
    assert out4.shape == x4.shape and out4.dtype == x4.dtype
    assert jnp.allclose(out4, ref4, atol=1e-6, rtol=1e-6)

    # --- 2D case: small (N=8, C=4); N*C=32 not a multiple of 128, so this
    # exercises the row-tiled fallback path. ---
    x2 = jax.random.normal(k3, (8, C), dtype=jnp.float32)
    out2 = jax.block_until_ready(add_bias_2d(x2, bias))
    ref2 = x2 + bias.reshape(1, C)
    assert out2.shape == x2.shape and out2.dtype == x2.dtype
    assert jnp.allclose(out2, ref2, atol=1e-6, rtol=1e-6)

    # --- 2D case: small C, lane-dense refold path (N*C divisible by 128). ---
    x2b = jax.random.normal(k4, (4096, C), dtype=jnp.float32)
    out2b = jax.block_until_ready(add_bias_2d(x2b, bias))
    ref2b = x2b + bias.reshape(1, C)
    assert jnp.allclose(out2b, ref2b, atol=1e-6, rtol=1e-6)

    # --- 2D case: wider hidden dim exercising a multi-step pipelined grid. ---
    C_big = 512
    bias_big = jax.random.normal(k5, (C_big,), dtype=jnp.float32)
    x2c = jax.random.normal(k5, (4096, C_big), dtype=jnp.float32)
    out2c = jax.block_until_ready(add_bias_2d(x2c, bias_big))
    ref2c = x2c + bias_big.reshape(1, C_big)
    assert jnp.allclose(out2c, ref2c, atol=1e-6, rtol=1e-6)

    print("KERNEL_OK")
</pallas_src>

<mosaic_0001>
module attributes {stable_mosaic.version = 11 : i64} {
  func.func @_add_kernel(%arg0: i32, %arg1: memref<2x4x256xf32, #tpu.memory_space<vmem>>, %arg2: memref<1x4x1xf32, #tpu.memory_space<vmem>>, %arg3: memref<2x4x256xf32, #tpu.memory_space<vmem>>) attributes {dimension_semantics = [#tpu.dimension_semantics<parallel>], iteration_bounds = array<i64: 1>, scalar_prefetch = 0 : i64, scratch_operands = 0 : i64, tpu.core_type = #tpu.core_type<tc>, window_params = [{transform_indices = @transform_0, window_bounds = array<i64: 2, 4, 256>}, {pipeline_mode = #tpu.pipeline_mode<synchronous>, transform_indices = @transform_1, window_bounds = array<i64: 1, 4, 1>}, {transform_indices = @transform_2, window_bounds = array<i64: 2, 4, 256>}]} {
    %c0 = arith.constant 0 : index
    %c0_0 = arith.constant 0 : index
    %c0_1 = arith.constant 0 : index
    %0 = vector.load %arg1[%c0, %c0_0, %c0_1] : memref<2x4x256xf32, #tpu.memory_space<vmem>>, vector<2x4x256xf32>
    %c0_2 = arith.constant 0 : index
    %c0_3 = arith.constant 0 : index
    %c0_4 = arith.constant 0 : index
    %1 = vector.load %arg2[%c0_2, %c0_3, %c0_4] : memref<1x4x1xf32, #tpu.memory_space<vmem>>, vector<1x4x1xf32>
    %2 = vector.broadcast %1 : vector<1x4x1xf32> to vector<2x4x256xf32>
    %3 = arith.addf %0, %2 : vector<2x4x256xf32>
    %c0_5 = arith.constant 0 : index
    %c0_6 = arith.constant 0 : index
    %c0_7 = arith.constant 0 : index
    %4 = vector.load %arg3[%c0_5, %c0_6, %c0_7] : memref<2x4x256xf32, #tpu.memory_space<vmem>>, vector<2x4x256xf32>
    tpu.vector_store %arg3[%c0_5, %c0_6, %c0_7], %3 {strides = array<i32>} : memref<2x4x256xf32, #tpu.memory_space<vmem>>, vector<2x4x256xf32>,
    return
  }
  func.func @transform_0(%arg0: i32) -> (i32, i32, i32) {
    %c0_i32 = arith.constant 0 : i32
    %c0_i32_0 = arith.constant 0 : i32
    %c0_i32_1 = arith.constant 0 : i32
    return %arg0, %c0_i32, %c0_i32_0 : i32, i32, i32
  }
  func.func @transform_1(%arg0: i32) -> (i32, i32, i32) {
    %c0_i32 = arith.constant 0 : i32
    %c0_i32_0 = arith.constant 0 : i32
    %c0_i32_1 = arith.constant 0 : i32
    %c0_i32_2 = arith.constant 0 : i32
    return %c0_i32, %c0_i32_0, %c0_i32_1 : i32, i32, i32
  }
  func.func @transform_2(%arg0: i32) -> (i32, i32, i32) {
    %c0_i32 = arith.constant 0 : i32
    %c0_i32_0 = arith.constant 0 : i32
    %c0_i32_1 = arith.constant 0 : i32
    return %arg0, %c0_i32, %c0_i32_0 : i32, i32, i32
  }
}

</mosaic_0001>

<bundles_post_ra>
// kernel: tpu_custom_call.1
= control target key start
LH: loop header
LB: loop body
LE: loop exit
PB: predicated region body
PF: predicated region fallthrough
CT: control target
= control target key end

     0   :  { %7 = vsyncpa [#allocation3], 0  ;;  %s149_s0 = inlined_call_operand.hbm [shape: f32[2,4,256], index: 0, kind: input, shape index: {}]   ;;  %s150_s1 = inlined_call_operand.vmem [shape: f32[1,4,1], index: 1, kind: input, shape index: {}]   ;;  %s151_s2 = inlined_call_operand.hbm [shape: f32[2,4,256], index: 2, kind: output, shape index: {}]  }
   0x1   :  { %8 = vsyncpa [#allocation4], 0  ;;  %s113_s9 = smov [#allocation2]  }
   0x2   :  { %s14_s10 = sshll.u32 %s113_s9, 4  ;;  %s15_s10 = int_to_ptr.vmem [resolvable:$true] %s14_s10 }
   0x3   :  { %s77_s11 = scalar_lea.vmem %s15_s10, 256  ;;  %p82_p1 = scmp.lt.s32.totalorder %s15_s10, %s15_s10 }
   0x4   :  { %p78_p0 = scmp.ne.s32.totalorder %s15_s10, %s77_s11  ;;  %p83_p2 = scmp.lt.s32.totalorder %s77_s11, %s77_s11 }
   0x6   :  { %p84_p3 = por %p83_p2, %p82_p1 }
   0x8   :  { %p85_p4 = pnand %p84_p3, %p78_p0 }
   0xa   :  { %88 = shalt.err (!%p85_p4)
}
   0xb   :  { %s114_s12 = smov 128   ;;  %s115_s13 = smov 8  }
   0xc   :  { %20 = dma.hbm_to_vmem [thread:$0]  %s149_s0, 256, %s15_s10, [#allocation3], %s114_s12, %s114_s12, %s115_s13  }
   0xd   :  { %109 = dma.done.wait [#allocation3], 256  }
   0xe   :  { %110 = vsyncadd [#allocation3], 4294967040  ;;  %v116_v0 = vmov 0   ;;  %v28_v1 = vld [vmem:[%s150_s1] sm:$0xf]  ;;  %v36_v4 = vlaneseq  ;;  %v27_v10 = vld [vmem:[#allocation2 + $0x8] sm:$0xff] }
   0xf   :  { %68 = vset.pattern.permute.xlu0 %v116_v0  ;;  %v117_v2 = vmov 839922192   ;;  %v26_v9 = vld [vmem:[#allocation2] sm:$0xff]  ;;  %s118_s18 = smov [#allocation5]  }
  0x10   :  { %31 = vperm.xlu0 %68, %v28_v1   ;;  %v34_v3 = vunpack.c.l.s4 %v117_v2  ;;  %v37_v6 = vshrl.u32 %v36_v4, 7  ;;  %s50_s0 = sshll.u32 %s118_s18, 4  ;;  %s51_s0 = int_to_ptr.vmem [resolvable:$true] %s50_s0 }
  0x11   :  { %s89_s19 = scalar_lea.vmem %s51_s0, 256  ;;  %p94_p6 = scmp.lt.s32.totalorder %s51_s0, %s51_s0 }
  0x12   :  { %v35_v5 = vunpack.c.0.s8 %v34_v3  ;;  %p90_p5 = scmp.ne.s32.totalorder %s51_s0, %s89_s19  ;;  %p95_p7 = scmp.lt.s32.totalorder %s89_s19, %s89_s19 }
  0x14   :  { %v38_v7 = vsub.s32 %v35_v5, %v37_v6  ;;  %p96_p8 = por %p95_p7, %p94_p6 }
  0x16   :  { %p97_p9 = pnand %p96_p8, %p90_p5 }
  0x8b   :  { %v32_v8 = vpop.permute.xlu0 %31 }
  0x8c   :  { %v39_v11 = vrot.slane %v32_v8, %v38_v7 }
  0x8e   :  { %v41_v12 = vadd.f32 %v39_v11, %v26_v9  ;;  %v42_v13 = vadd.f32 %v39_v11, %v27_v10 }
  0x90   :  { %43 = vst [vmem:[#allocation5] sm:$0xff] %v41_v12  ;;  %44 = vst [vmem:[#allocation5 + $0x8] sm:$0xff] %v42_v13 }
  0x91   :  { %100 = shalt.err (!%p97_p9)
}
  0x92   :  { %56 = dma.vmem_to_hbm [thread:$0]  %s51_s0, 256, %s151_s2, [#allocation4], %s114_s12, %s114_s12, %s115_s13  }
  0x93   :  { %111 = dma.done.wait [#allocation4], 256  }
  0x94   :  { %112 = vsyncadd [#allocation4], 4294967040 }
  0x95   :  { %60 = vsyncpa [#allocation3], 1 }
  0x96   :  { %61 = vsyncpa [#allocation4], 1 }

</bundles_post_ra>
